<compile_context>
chip_gen: v6e
topology: v6e:2x2x1
jax: 0.10.0
libtpu: 0.0.40
codegen_flags: <defaults>
</compile_context>

<pallas_src>
from functools import partial

import jax
import jax.numpy as jnp
from jax.experimental import pallas as pl
from jax.experimental.pallas import tpu as pltpu


def _round_up(x, m):
    return ((x + m - 1) // m) * m


# ---------------------------------------------------------------------------
# Kernel 1: all hidden layers fused.   refs = (x, w1, b1, ..., wL, bL, out)
#           h = relu(h @ w_l + b_l)   (BN already folded into w_l / b_l)
# ---------------------------------------------------------------------------
def _hidden_mlp_kernel(*refs, num_layers):
    x_ref = refs[0]
    o_ref = refs[-1]
    h = x_ref[...]
    for l in range(num_layers):
        w_ref = refs[1 + 2 * l]
        b_ref = refs[2 + 2 * l]
        h = jnp.dot(h, w_ref[...], preferred_element_type=jnp.float32) + b_ref[...]
        h = jnp.maximum(h, 0.0)
    o_ref[...] = h.astype(o_ref.dtype)


def hidden_mlp(x, weights, biases):
    """x: (B, K) f32; weights[l]: (K_l, H_l) f32; biases[l]: (1, H_l) f32 -> (B, H_last) f32."""
    B = x.shape[0]
    num_layers = len(weights)
    out_dim = weights[-1].shape[1]

    operands = [x]
    in_specs = [pl.BlockSpec(x.shape, lambda i: (0, 0))]
    for w, b in zip(weights, biases):
        operands += [w, b]
        in_specs += [
            pl.BlockSpec(w.shape, lambda i: (0, 0)),
            pl.BlockSpec(b.shape, lambda i: (0, 0)),
        ]

    return pl.pallas_call(
        partial(_hidden_mlp_kernel, num_layers=num_layers),
        out_shape=jax.ShapeDtypeStruct((B, out_dim), jnp.float32),
        grid_spec=pltpu.PrefetchScalarGridSpec(
            num_scalar_prefetch=0,
            grid=(1,),
            in_specs=in_specs,
            out_specs=pl.BlockSpec((B, out_dim), lambda i: (0, 0)),
        ),
        compiler_params=pltpu.CompilerParams(dimension_semantics=("arbitrary",)),
    )(*operands)


# ---------------------------------------------------------------------------
# Kernel 2: output head   y = x @ W + b   (W streamed in large bf16 column tiles)
# ---------------------------------------------------------------------------
def _head_kernel(x_ref, w_ref, b_ref, o_ref):
    x = x_ref[...].astype(w_ref.dtype)  # bf16 compute on the MXU, f32 accumulation
    acc = jnp.dot(x, w_ref[...], preferred_element_type=jnp.float32)
    o_ref[...] = (acc + b_ref[...]).astype(o_ref.dtype)


def head_linear(x, w_pad, b_pad, *, tile_n):
    """x: (B, K) f32; w_pad: (K, N_pad) bf16; b_pad: (1, N_pad) f32 -> (B, N_pad) f32."""
    B, K = x.shape
    K2, n_pad = w_pad.shape
    assert K == K2, (K, K2)
    assert n_pad % tile_n == 0, (n_pad, tile_n)

    grid = (n_pad // tile_n,)
    flops = 2 * B * K * n_pad
    bytes_accessed = (
        K * n_pad * w_pad.dtype.itemsize   # weight stream (dominant)
        + B * K * 4                        # resident activations
        + n_pad * 4                        # bias
        + B * n_pad * 4                    # output
    )

    return pl.pallas_call(
        _head_kernel,
        out_shape=jax.ShapeDtypeStruct((B, n_pad), jnp.float32),
        grid_spec=pltpu.PrefetchScalarGridSpec(
            num_scalar_prefetch=0,
            grid=grid,
            in_specs=[
                pl.BlockSpec((B, K), lambda j: (0, 0)),        # x: resident across N grid
                pl.BlockSpec((K, tile_n), lambda j: (0, j)),   # W column tile (bf16)
                pl.BlockSpec((1, tile_n), lambda j: (0, j)),   # bias tile
            ],
            out_specs=pl.BlockSpec((B, tile_n), lambda j: (0, j)),
        ),
        compiler_params=pltpu.CompilerParams(dimension_semantics=("parallel",)),
        cost_estimate=pl.CostEstimate(
            flops=flops, transcendentals=0, bytes_accessed=bytes_accessed
        ),
    )(x, w_pad, b_pad)


# ---------------------------------------------------------------------------
# Parameter init (PyTorch-style, deterministic) + inference-time preparation
# ---------------------------------------------------------------------------
def init_twl_params(key, input_size, hidden_sizes, output_size):
    params = {"hidden": [], "out": None}
    dims = [input_size] + list(hidden_sizes)
    for i in range(len(hidden_sizes)):
        key, k_w, k_b = jax.random.split(key, 3)
        bound = 1.0 / jnp.sqrt(dims[i])
        w = jax.random.uniform(k_w, (dims[i], dims[i + 1]), jnp.float32, -bound, bound)
        b = jax.random.uniform(k_b, (dims[i + 1],), jnp.float32, -bound, bound)
        bn = {
            "gamma": jnp.ones((dims[i + 1],), jnp.float32),
            "beta": jnp.zeros((dims[i + 1],), jnp.float32),
            "running_mean": jnp.zeros((dims[i + 1],), jnp.float32),
            "running_var": jnp.ones((dims[i + 1],), jnp.float32),
            "eps": 1e-5,
        }
        params["hidden"].append({"w": w, "b": b, "bn": bn})
    key, k_w, k_b = jax.random.split(key, 3)
    bound = 1.0 / jnp.sqrt(dims[-1])
    params["out"] = {
        "w": jax.random.uniform(k_w, (dims[-1], output_size), jnp.float32, -bound, bound),
        "b": jax.random.uniform(k_b, (output_size,), jnp.float32, -bound, bound),
    }
    return params


def prepare_inference_params(params, *, head_tile_n=4096, head_dtype=jnp.bfloat16):
    """Fold eval-mode BN into the Linear params, cast + pad the output head (done ONCE)."""
    hidden = []
    for layer in params["hidden"]:
        w, b, bn = layer["w"], layer["b"], layer["bn"]
        inv_std = 1.0 / jnp.sqrt(bn["running_var"] + bn["eps"])
        scale = bn["gamma"] * inv_std
        shift = bn["beta"] - bn["running_mean"] * scale
        w_eff = (w * scale[None, :]).astype(jnp.float32)
        b_eff = ((b * scale + shift)[None, :]).astype(jnp.float32)
        hidden.append((w_eff, b_eff))

    w = params["out"]["w"]
    b = params["out"]["b"]
    k, n = w.shape
    # Shrink the tile if the head is small; pad N up to a tile multiple so stores stay
    # lane-dense and the real 179269-wide head works without a masked tail tile.
    tile_n = min(head_tile_n, _round_up(n, 128))
    n_pad = _round_up(n, tile_n)
    w_pad = jnp.zeros((k, n_pad), head_dtype).at[:, :n].set(w.astype(head_dtype))
    b_pad = jnp.zeros((1, n_pad), jnp.float32).at[0, :n].set(b)
    return {"hidden": hidden, "head": {"w": w_pad, "b": b_pad, "n": n, "tile_n": tile_n}}


def twl_forward(infer_params, x):
    """Eval-mode forward. Dropout == identity; BN folded; head weights bf16."""
    # TODO(synk): training-mode BatchNorm (batch statistics) and stochastic Dropout are not
    #             implemented; this matches model.eval() semantics.
    ws = [w for w, _ in infer_params["hidden"]]
    bs = [b for _, b in infer_params["hidden"]]
    h = hidden_mlp(x, ws, bs)
    head = infer_params["head"]
    y = head_linear(h, head["w"], head["b"], tile_n=head["tile_n"])
    return y[:, : head["n"]]


# ---------------------------------------------------------------------------
# Pure-JAX references
# ---------------------------------------------------------------------------
def twl_forward_ref_semantic(params, x):
    """Original eval-mode semantics, all f32 (loose check: head storage is bf16)."""
    for layer in params["hidden"]:
        w, b, bn = layer["w"], layer["b"], layer["bn"]
        y = x @ w + b
        y = (y - bn["running_mean"]) / jnp.sqrt(bn["running_var"] + bn["eps"])
        y = y * bn["gamma"] + bn["beta"]
        x = jnp.maximum(y, 0.0)
    return x @ params["out"]["w"] + params["out"]["b"]


def twl_forward_ref_prepared(infer_params, x):
    """Reference computed from the exact stored (folded f32 / bf16 head) representation."""
    for w, b in infer_params["hidden"]:
        x = jnp.maximum(x @ w + b, 0.0)
    head = infer_params["head"]
    xb = x.astype(jnp.bfloat16).astype(jnp.float32)
    y = xb @ head["w"].astype(jnp.float32) + head["b"]
    return y[:, : head["n"]]


# ---------------------------------------------------------------------------
if __name__ == "__main__":
    # Small shapes consistent with the module: input_size=25, three hidden layers (module
    # default width 256), and a small stand-in for the 179269-wide head that is NOT a
    # multiple of 128, to exercise the padding path.
    batch = 8
    input_size = 25
    hidden_sizes = [256, 256, 256]
    output_size = 1003

    key = jax.random.PRNGKey(0)
    key, k_params, k_x = jax.random.split(key, 3)
    params = init_twl_params(k_params, input_size, hidden_sizes, output_size)
    infer = prepare_inference_params(params)
    x = jax.random.normal(k_x, (batch, input_size), jnp.float32)

    out = jax.block_until_ready(twl_forward(infer, x))
    assert out.shape == (batch, output_size)

    # Tight check against the stored-parameter representation (folded f32 hidden, bf16 head).
    ref_prep = twl_forward_ref_prepared(infer, x)
    assert jnp.allclose(out, ref_prep, atol=1e-3, rtol=1e-3), "mismatch vs prepared-params reference"

    # Looser check against full-f32 eval-mode semantics (tolerance covers bf16 head weights).
    ref_sem = twl_forward_ref_semantic(params, x)
    assert jnp.allclose(out, ref_sem, atol=5e-2, rtol=5e-2), "mismatch vs eval-mode semantic reference"

    print("KERNEL_OK")
</pallas_src>

<mosaic_0001>
module attributes {stable_mosaic.version = 11 : i64} {
  func.func @_hidden_mlp_kernel(%arg0: i32, %arg1: memref<8x25xf32, #tpu.memory_space<vmem>>, %arg2: memref<25x256xf32, #tpu.memory_space<vmem>>, %arg3: memref<1x256xf32, #tpu.memory_space<vmem>>, %arg4: memref<256x256xf32, #tpu.memory_space<vmem>>, %arg5: memref<1x256xf32, #tpu.memory_space<vmem>>, %arg6: memref<256x256xf32, #tpu.memory_space<vmem>>, %arg7: memref<1x256xf32, #tpu.memory_space<vmem>>, %arg8: memref<8x256xf32, #tpu.memory_space<vmem>>) attributes {dimension_semantics = [#tpu.dimension_semantics<arbitrary>], iteration_bounds = array<i64: 1>, scalar_prefetch = 0 : i64, scratch_operands = 0 : i64, tpu.core_type = #tpu.core_type<tc>, window_params = [{pipeline_mode = #tpu.pipeline_mode<synchronous>, transform_indices = @transform_0, window_bounds = array<i64: 8, 25>}, {pipeline_mode = #tpu.pipeline_mode<synchronous>, transform_indices = @transform_1, window_bounds = array<i64: 25, 256>}, {pipeline_mode = #tpu.pipeline_mode<synchronous>, transform_indices = @transform_2, window_bounds = array<i64: 1, 256>}, {pipeline_mode = #tpu.pipeline_mode<synchronous>, transform_indices = @transform_3, window_bounds = array<i64: 256, 256>}, {pipeline_mode = #tpu.pipeline_mode<synchronous>, transform_indices = @transform_4, window_bounds = array<i64: 1, 256>}, {pipeline_mode = #tpu.pipeline_mode<synchronous>, transform_indices = @transform_5, window_bounds = array<i64: 256, 256>}, {pipeline_mode = #tpu.pipeline_mode<synchronous>, transform_indices = @transform_6, window_bounds = array<i64: 1, 256>}, {pipeline_mode = #tpu.pipeline_mode<synchronous>, transform_indices = @transform_7, window_bounds = array<i64: 8, 256>}]} {
    %c0 = arith.constant 0 : index
    %c0_0 = arith.constant 0 : index
    %0 = vector.load %arg1[%c0, %c0_0] : memref<8x25xf32, #tpu.memory_space<vmem>>, vector<8x25xf32>
    %c0_1 = arith.constant 0 : index
    %c0_2 = arith.constant 0 : index
    %1 = vector.load %arg2[%c0_1, %c0_2] : memref<25x256xf32, #tpu.memory_space<vmem>>, vector<25x256xf32>
    %cst = arith.constant dense<0.000000e+00> : vector<8x256xf32>
    %2 = tpu.matmul %0, %1, %cst {dimension_numbers = #tpu.dot_dimension_numbers<[1], [0], [0], [1], [0, 0, 1, 1], [], []>} : vector<8x25xf32>, vector<25x256xf32>, vector<8x256xf32> -> vector<8x256xf32>
    %c0_3 = arith.constant 0 : index
    %c0_4 = arith.constant 0 : index
    %3 = vector.load %arg3[%c0_3, %c0_4] : memref<1x256xf32, #tpu.memory_space<vmem>>, vector<1x256xf32>
    %4 = vector.broadcast %3 : vector<1x256xf32> to vector<8x256xf32>
    %5 = arith.addf %2, %4 : vector<8x256xf32>
    %cst_5 = arith.constant 0.000000e+00 : f32
    %6 = vector.broadcast %cst_5 : f32 to vector<8x256xf32>
    %7 = arith.maximumf %5, %6 : vector<8x256xf32>
    %c0_6 = arith.constant 0 : index
    %c0_7 = arith.constant 0 : index
    %8 = vector.load %arg4[%c0_6, %c0_7] : memref<256x256xf32, #tpu.memory_space<vmem>>, vector<256x256xf32>
    %cst_8 = arith.constant dense<0.000000e+00> : vector<8x256xf32>
    %9 = tpu.matmul %7, %8, %cst_8 {dimension_numbers = #tpu.dot_dimension_numbers<[1], [0], [0], [1], [0, 0, 1, 1], [], []>} : vector<8x256xf32>, vector<256x256xf32>, vector<8x256xf32> -> vector<8x256xf32>
    %c0_9 = arith.constant 0 : index
    %c0_10 = arith.constant 0 : index
    %10 = vector.load %arg5[%c0_9, %c0_10] : memref<1x256xf32, #tpu.memory_space<vmem>>, vector<1x256xf32>
    %11 = vector.broadcast %10 : vector<1x256xf32> to vector<8x256xf32>
    %12 = arith.addf %9, %11 : vector<8x256xf32>
    %cst_11 = arith.constant 0.000000e+00 : f32
    %13 = vector.broadcast %cst_11 : f32 to vector<8x256xf32>
    %14 = arith.maximumf %12, %13 : vector<8x256xf32>
    %c0_12 = arith.constant 0 : index
    %c0_13 = arith.constant 0 : index
    %15 = vector.load %arg6[%c0_12, %c0_13] : memref<256x256xf32, #tpu.memory_space<vmem>>, vector<256x256xf32>
    %cst_14 = arith.constant dense<0.000000e+00> : vector<8x256xf32>
    %16 = tpu.matmul %14, %15, %cst_14 {dimension_numbers = #tpu.dot_dimension_numbers<[1], [0], [0], [1], [0, 0, 1, 1], [], []>} : vector<8x256xf32>, vector<256x256xf32>, vector<8x256xf32> -> vector<8x256xf32>
    %c0_15 = arith.constant 0 : index
    %c0_16 = arith.constant 0 : index
    %17 = vector.load %arg7[%c0_15, %c0_16] : memref<1x256xf32, #tpu.memory_space<vmem>>, vector<1x256xf32>
    %18 = vector.broadcast %17 : vector<1x256xf32> to vector<8x256xf32>
    %19 = arith.addf %16, %18 : vector<8x256xf32>
    %cst_17 = arith.constant 0.000000e+00 : f32
    %20 = vector.broadcast %cst_17 : f32 to vector<8x256xf32>
    %21 = arith.maximumf %19, %20 : vector<8x256xf32>
    %c0_18 = arith.constant 0 : index
    %c0_19 = arith.constant 0 : index
    %22 = vector.load %arg8[%c0_18, %c0_19] : memref<8x256xf32, #tpu.memory_space<vmem>>, vector<8x256xf32>
    tpu.vector_store %arg8[%c0_18, %c0_19], %21 {strides = array<i32>} : memref<8x256xf32, #tpu.memory_space<vmem>>, vector<8x256xf32>,
    return
  }
  func.func @transform_0(%arg0: i32) -> (i32, i32) {
    %c0_i32 = arith.constant 0 : i32
    %c0_i32_0 = arith.constant 0 : i32
    %c0_i32_1 = arith.constant 0 : i32
    return %c0_i32, %c0_i32_0 : i32, i32
  }
  func.func @transform_1(%arg0: i32) -> (i32, i32) {
    %c0_i32 = arith.constant 0 : i32
    %c0_i32_0 = arith.constant 0 : i32
    %c0_i32_1 = arith.constant 0 : i32
    return %c0_i32, %c0_i32_0 : i32, i32
  }
  func.func @transform_2(%arg0: i32) -> (i32, i32) {
    %c0_i32 = arith.constant 0 : i32
    %c0_i32_0 = arith.constant 0 : i32
    %c0_i32_1 = arith.constant 0 : i32
    return %c0_i32, %c0_i32_0 : i32, i32
  }
  func.func @transform_3(%arg0: i32) -> (i32, i32) {
    %c0_i32 = arith.constant 0 : i32
    %c0_i32_0 = arith.constant 0 : i32
    %c0_i32_1 = arith.constant 0 : i32
    return %c0_i32, %c0_i32_0 : i32, i32
  }
  func.func @transform_4(%arg0: i32) -> (i32, i32) {
    %c0_i32 = arith.constant 0 : i32
    %c0_i32_0 = arith.constant 0 : i32
    %c0_i32_1 = arith.constant 0 : i32
    return %c0_i32, %c0_i32_0 : i32, i32
  }
  func.func @transform_5(%arg0: i32) -> (i32, i32) {
    %c0_i32 = arith.constant 0 : i32
    %c0_i32_0 = arith.constant 0 : i32
    %c0_i32_1 = arith.constant 0 : i32
    return %c0_i32, %c0_i32_0 : i32, i32
  }
  func.func @transform_6(%arg0: i32) -> (i32, i32) {
    %c0_i32 = arith.constant 0 : i32
    %c0_i32_0 = arith.constant 0 : i32
    %c0_i32_1 = arith.constant 0 : i32
    return %c0_i32, %c0_i32_0 : i32, i32
  }
  func.func @transform_7(%arg0: i32) -> (i32, i32) {
    %c0_i32 = arith.constant 0 : i32
    %c0_i32_0 = arith.constant 0 : i32
    %c0_i32_1 = arith.constant 0 : i32
    return %c0_i32, %c0_i32_0 : i32, i32
  }
}

</mosaic_0001>

<bundles_post_ra>
// kernel: tpu_custom_call.1
= control target key start
LH: loop header
LB: loop body
LE: loop exit
PB: predicated region body
PF: predicated region fallthrough
CT: control target
= control target key end

     0   :  { %12 = vsyncpa [#allocation3], 0  ;;  %s702_s0 = inlined_call_operand.hbm [shape: f32[8,25], index: 0, kind: input, shape index: {}]   ;;  %s703_s1 = inlined_call_operand.hbm [shape: f32[25,256], index: 1, kind: input, shape index: {}]   ;;  %s704_s2 = inlined_call_operand.vmem [shape: f32[1,256], index: 2, kind: input, shape index: {}]   ;;  %s705_s3 = inlined_call_operand.hbm [shape: f32[256,256], index: 3, kind: input, shape index: {}]   ;;  %s706_s4 = inlined_call_operand.vmem [shape: f32[1,256], index: 4, kind: input, shape index: {}]   ;;  %s707_s5 = inlined_call_operand.hbm [shape: f32[256,256], index: 5, kind: input, shape index: {}]   ;;  %s708_s6 = inlined_call_operand.vmem [shape: f32[1,256], index: 6, kind: input, shape index: {}]   ;;  %s709_s7 = inlined_call_operand.hbm [shape: f32[8,256], index: 7, kind: output, shape index: {}]  }
   0x1   :  { %13 = vsyncpa [#allocation6], 0 }
   0x2   :  { %14 = vsyncpa [#allocation9], 0 }
   0x3   :  { %15 = vsyncpa [#allocation4], 0  ;;  %s621_s24 = smov [#allocation5]  }
   0x4   :  { %s31_s25 = sshll.u32 %s621_s24, 4  ;;  %s32_s25 = int_to_ptr.vmem [resolvable:$true] %s31_s25 }
   0x5   :  { %s521_s26 = scalar_lea.vmem %s32_s25, 1024  ;;  %p526_p1 = scmp.lt.s32.totalorder %s32_s25, %s32_s25 }
   0x6   :  { %p522_p0 = scmp.ne.s32.totalorder %s32_s25, %s521_s26  ;;  %p527_p2 = scmp.lt.s32.totalorder %s521_s26, %s521_s26 }
   0x8   :  { %p528_p3 = por %p527_p2, %p526_p1 }
   0xa   :  { %p529_p4 = pnand %p528_p3, %p522_p0 }
   0xc   :  { %532 = shalt.err (!%p529_p4)
}
   0xd   :  { %s622_s27 = smov 256   ;;  %s623_s28 = smov 16  }
   0xe   :  { %37 = dma.hbm_to_vmem [thread:$0]  %s703_s1, 1024, %s32_s25, [#allocation6], %s622_s27, %s622_s27, %s623_s28  }
   0xf   :  { %s624_s8 = smov [#allocation2]   ;;  %s625_s10 = smov [#allocation7]  }
  0x10   :  { %s22_s9 = sshll.u32 %s624_s8, 4  ;;  %s45_s11 = sshll.u32 %s625_s10, 4  ;;  %s23_s9 = int_to_ptr.vmem [resolvable:$true] %s22_s9  ;;  %s46_s11 = int_to_ptr.vmem [resolvable:$true] %s45_s11 }
  0x11   :  { %s541_s12 = scalar_lea.vmem %s23_s9, 128  ;;  %p546_p6 = scmp.lt.s32.totalorder %s23_s9, %s23_s9 }
  0x12   :  { %p542_p5 = scmp.ne.s32.totalorder %s23_s9, %s541_s12  ;;  %p547_p7 = scmp.lt.s32.totalorder %s541_s12, %s541_s12 }
  0x14   :  { %p548_p8 = por %p547_p7, %p546_p6 }
  0x16   :  { %p549_p9 = pnand %p548_p8, %p542_p5 }
  0x18   :  { %552 = shalt.err (!%p549_p9)
}
  0x19   :  { %25 = dma.hbm_to_vmem [thread:$0]  %s702_s0, 128, %s23_s9, [#allocation3]  }
  0x1a   :  { %s561_s15 = scalar_lea.vmem %s46_s11, 8192  ;;  %p566_p11 = scmp.lt.s32.totalorder %s46_s11, %s46_s11 }
  0x1b   :  { %p562_p10 = scmp.ne.s32.totalorder %s46_s11, %s561_s15  ;;  %p567_p12 = scmp.lt.s32.totalorder %s561_s15, %s561_s15 }
  0x1d   :  { %p568_p13 = por %p567_p12, %p566_p11 }
  0x1f   :  { %p569_p0 = pnand %p568_p13, %p562_p10 }
  0x21   :  { %572 = shalt.err (!%p569_p0)
}
  0x22   :  { %51 = dma.hbm_to_vmem [thread:$0]  %s705_s3, 8192, %s46_s11, [#allocation6], %s622_s27, %s622_s27, %s623_s28  }
  0x23   :  { %s626_s17 = smov [#allocation8]  }
  0x24   :  { %s59_s18 = sshll.u32 %s626_s17, 4  ;;  %s60_s18 = int_to_ptr.vmem [resolvable:$true] %s59_s18 }
  0x25   :  { %s581_s19 = scalar_lea.vmem %s60_s18, 8192  ;;  %p586_p2 = scmp.lt.s32.totalorder %s60_s18, %s60_s18 }
  0x26   :  { %p582_p1 = scmp.ne.s32.totalorder %s60_s18, %s581_s19  ;;  %p587_p3 = scmp.lt.s32.totalorder %s581_s19, %s581_s19 }
  0x28   :  { %p588_p4 = por %p587_p3, %p586_p2 }
  0x2a   :  { %p589_p5 = pnand %p588_p4, %p582_p1 }
  0x2c   :  { %592 = shalt.err (!%p589_p5)
}
  0x2d   :  { %65 = dma.hbm_to_vmem [thread:$0]  %s707_s5, 8192, %s60_s18, [#allocation9], %s622_s27, %s622_s27, %s623_s28  }
  0x2e   :  { %613 = dma.done.wait [#allocation3], 128  }
  0x2f   :  { %614 = vsyncadd [#allocation3], 4294967168 }
  0x30   :  { %615 = dma.done.wait [#allocation6], 9216  }
  0x31   :  { %616 = vsyncadd [#allocation6], 4294958080 }
  0x32   :  { %617 = dma.done.wait [#allocation9], 8192  }
  0x33   :  { %618 = vsyncadd [#allocation9], 4294959104  ;;  %v627_v0 = vmov 0.0   ;;  %vm105_vm0 = vcmask 1040384   ;;  %v88_v1 = vld [vmem:[#allocation5 + $0x38] sm:$0x1] }
  0x34   :  { %176 = vmatprep.mubr.f32.mxu0 %v627_v0  ;;  %v87_v2 = vld [vmem:[#allocation5 + $0x30] sm:$0x1]  ;;  %v86_v3 = vld [vmem:[#allocation5 + $0x28] sm:$0xff]  ;;  %502 = vmatprep.subr.msk.mxu0 %vm105_vm0, %v88_v1  ;;  %v85_v4 = vld [vmem:[#allocation5 + $0x20] sm:$0xff]  ;;  %vm101_vm1 = vcmask 203776  }
  0x35   :  { %503 = vmatpush1.msk.msra.mxu0 %vm105_vm0, %v87_v2  ;;  %v84_v5 = vld [vmem:[#allocation5 + $0x18] sm:$0xff]  ;;  %v83_v6 = vld [vmem:[#allocation5 + $0x10] sm:$0xff]  ;;  %v214_v9 = vld [vmem:[#allocation7 + $0xe8] sm:$0xff] }
  0x36   :  { %138 = vmatprep.subr.mxu0 %v86_v3  ;;  %v216_v7 = vld [vmem:[#allocation7 + $0xf8] sm:$0xff]  ;;  %v215_v8 = vld [vmem:[#allocation7 + $0xf0] sm:$0xff]  ;;  %v82_v10 = vld [vmem:[#allocation5 + $0x8] sm:$0xff] }
  0x37   :  { %139 = vmatpush1.msra.mxu0 %v85_v4  ;;  %261 = vmatprep.subr.mxu1 %v216_v7  ;;  %v213_v11 = vld [vmem:[#allocation7 + $0xe0] sm:$0xff]  ;;  %v212_v13 = vld [vmem:[#allocation7 + $0xd8] sm:$0xff]  ;;  %v211_v15 = vld [vmem:[#allocation7 + $0xd0] sm:$0xff] }
  0x38   :  { %140 = vmatprep.subr.mxu0 %v84_v5  ;;  %v81_v12 = vld [vmem:[#allocation5] sm:$0xff]  ;;  %262 = vmatpush1.msra.mxu1 %v215_v8  ;;  %v80_v14 = vld [vmem:[#allocation2] sm:$0xff]  ;;  %v210_v16 = vld [vmem:[#allocation7 + $0xc8] sm:$0xff] }
  0x39   :  { %141 = vmatpush1.msra.mxu0 %v83_v6  ;;  %263 = vmatprep.subr.mxu1 %v214_v9  ;;  %v209_v17 = vld [vmem:[#allocation7 + $0xc0] sm:$0xff]  ;;  %v208_v18 = vld [vmem:[#allocation7 + $0xb8] sm:$0xff]  ;;  %v207_v19 = vld [vmem:[#allocation7 + $0xb0] sm:$0xff] }
  0x3a   :  { %142 = vmatprep.subr.mxu0 %v82_v10  ;;  %264 = vmatpush1.msra.mxu1 %v213_v11  ;;  %v206_v20 = vld [vmem:[#allocation7 + $0xa8] sm:$0xff]  ;;  %v205_v21 = vld [vmem:[#allocation7 + $0xa0] sm:$0xff]  ;;  %v204_v22 = vld [vmem:[#allocation7 + $0x98] sm:$0xff] }
  0x3b   :  { %143 = vmatpush1.msra.mxu0 %v81_v12  ;;  %265 = vmatprep.subr.mxu1 %v212_v13  ;;  %v203_v23 = vld [vmem:[#allocation7 + $0x90] sm:$0xff]  ;;  %v202_v24 = vld [vmem:[#allocation7 + $0x88] sm:$0xff]  ;;  %v201_v25 = vld [vmem:[#allocation7 + $0x80] sm:$0xff] }
  0x3c   :  { %504 = vmatmul.mubr.msk.f32.vlgmr.msra.gmra.mxu0 %vm101_vm1, %v80_v14  ;;  %266 = vmatpush1.msra.mxu1 %v211_v15  ;;  %v200_v26 = vld [vmem:[#allocation7 + $0x78] sm:$0xff]  ;;  %v199_v27 = vld [vmem:[#allocation7 + $0x70] sm:$0xff]  ;;  %v198_v28 = vld [vmem:[#allocation7 + $0x68] sm:$0xff] }
  0x3d   :  { %267 = vmatprep.subr.mxu1 %v210_v16  ;;  %v197_v29 = vld [vmem:[#allocation7 + $0x60] sm:$0xff]  ;;  %v196_v30 = vld [vmem:[#allocation7 + $0x58] sm:$0xff]  ;;  %v195_v31 = vld [vmem:[#allocation7 + $0x50] sm:$0xff] }
  0x3e   :  { %268 = vmatpush1.msra.mxu1 %v209_v17  ;;  %v194_v32 = vld [vmem:[#allocation7 + $0x48] sm:$0xff]  ;;  %v193_v33 = vld [vmem:[#allocation7 + $0x40] sm:$0xff]  ;;  %v192_v34 = vld [vmem:[#allocation7 + $0x38] sm:$0xff] }
  0x3f   :  { %269 = vmatprep.subr.mxu1 %v208_v18  ;;  %v191_v35 = vld [vmem:[#allocation7 + $0x30] sm:$0xff]  ;;  %v190_v36 = vld [vmem:[#allocation7 + $0x28] sm:$0xff]  ;;  %v189_v37 = vld [vmem:[#allocation7 + $0x20] sm:$0xff] }
  0x40   :  { %270 = vmatpush1.msra.mxu1 %v207_v19  ;;  %v188_v38 = vld [vmem:[#allocation7 + $0x18] sm:$0xff]  ;;  %v187_v39 = vld [vmem:[#allocation7 + $0x10] sm:$0xff]  ;;  %v186_v40 = vld [vmem:[#allocation7 + $0x8] sm:$0xff] }
  0x41   :  { %271 = vmatprep.subr.mxu1 %v206_v20  ;;  %v185_v41 = vld [vmem:[#allocation7] sm:$0xff]  ;;  %v248_v42 = vld [vmem:[#allocation7 + $0x1f8] sm:$0xff]  ;;  %v247_v43 = vld [vmem:[#allocation7 + $0x1f0] sm:$0xff] }
  0x42   :  { %272 = vmatpush1.msra.mxu1 %v205_v21  ;;  %v246_v44 = vld [vmem:[#allocation7 + $0x1e8] sm:$0xff]  ;;  %v245_v45 = vld [vmem:[#allocation7 + $0x1e0] sm:$0xff]  ;;  %v244_v46 = vld [vmem:[#allocation7 + $0x1d8] sm:$0xff] }
  0x43   :  { %273 = vmatprep.subr.mxu1 %v204_v22  ;;  %v243_v47 = vld [vmem:[#allocation7 + $0x1d0] sm:$0xff]  ;;  %v242_v48 = vld [vmem:[#allocation7 + $0x1c8] sm:$0xff]  ;;  %v241_v49 = vld [vmem:[#allocation7 + $0x1c0] sm:$0xff] }
  0x44   :  { %274 = vmatpush1.msra.mxu1 %v203_v23  ;;  %v240_v50 = vld [vmem:[#allocation7 + $0x1b8] sm:$0xff]  ;;  %v239_v51 = vld [vmem:[#allocation7 + $0x1b0] sm:$0xff]  ;;  %v238_v52 = vld [vmem:[#allocation7 + $0x1a8] sm:$0xff] }
  0x45   :  { %275 = vmatprep.subr.mxu1 %v202_v24  ;;  %v237_v53 = vld [vmem:[#allocation7 + $0x1a0] sm:$0xff]  ;;  %v236_v54 = vld [vmem:[#allocation7 + $0x198] sm:$0xff]  ;;  %v235_v55 = vld [vmem:[#allocation7 + $0x190] sm:$0xff] }
  0x46   :  { %276 = vmatpush1.msra.mxu1 %v201_v25  ;;  %v234_v56 = vld [vmem:[#allocation7 + $0x188] sm:$0xff]  ;;  %v233_v57 = vld [vmem:[#allocation7 + $0x180] sm:$0xff]  ;;  %v232_v58 = vld [vmem:[#allocation7 + $0x178] sm:$0xff] }
  0x47   :  { %277 = vmatprep.subr.mxu1 %v200_v26  ;;  %v231_v59 = vld [vmem:[#allocation7 + $0x170] sm:$0xff]  ;;  %v230_v60 = vld [vmem:[#allocation7 + $0x168] sm:$0xff]  ;;  %v229_v61 = vld [vmem:[#allocation7 + $0x160] sm:$0xff] }
  0x48   :  { %278 = vmatpush1.msra.mxu1 %v199_v27  ;;  %v228_v62 = vld [vmem:[#allocation7 + $0x158] sm:$0xff]  ;;  %v227_v63 = vld [vmem:[#allocation7 + $0x150] sm:$0xff]  ;;  %v226_v0 = vld [vmem:[#allocation7 + $0x148] sm:$0xff] }
  0x49   :  { %279 = vmatprep.subr.mxu1 %v198_v28  ;;  %v225_v1 = vld [vmem:[#allocation7 + $0x140] sm:$0xff]  ;;  %v224_v2 = vld [vmem:[#allocation7 + $0x138] sm:$0xff]  ;;  %v223_v3 = vld [vmem:[#allocation7 + $0x130] sm:$0xff] }
  0x4a   :  { %280 = vmatpush1.msra.mxu1 %v197_v29  ;;  %v222_v4 = vld [vmem:[#allocation7 + $0x128] sm:$0xff]  ;;  %v221_v5 = vld [vmem:[#allocation7 + $0x120] sm:$0xff]  ;;  %v220_v6 = vld [vmem:[#allocation7 + $0x118] sm:$0xff] }
  0x4b   :  { %281 = vmatprep.subr.mxu1 %v196_v30  ;;  %v219_v7 = vld [vmem:[#allocation7 + $0x110] sm:$0xff]  ;;  %v218_v8 = vld [vmem:[#allocation7 + $0x108] sm:$0xff]  ;;  %v217_v9 = vld [vmem:[#allocation7 + $0x100] sm:$0xff] }
  0x4c   :  { %282 = vmatpush1.msra.mxu1 %v195_v31  ;;  %v365_v10 = vld [vmem:[#allocation8 + $0xf8] sm:$0xff]  ;;  %v364_v11 = vld [vmem:[#allocation8 + $0xf0] sm:$0xff]  ;;  %v363_v12 = vld [vmem:[#allocation8 + $0xe8] sm:$0xff] }
  0x4d   :  { %283 = vmatprep.subr.mxu1 %v194_v32  ;;  %410 = vmatprep.subr.mxu0 %v365_v10  ;;  %v362_v13 = vld [vmem:[#allocation8 + $0xe0] sm:$0xff]  ;;  %v361_v14 = vld [vmem:[#allocation8 + $0xd8] sm:$0xff]  ;;  %v360_v15 = vld [vmem:[#allocation8 + $0xd0] sm:$0xff] }
  0x4e   :  { %284 = vmatpush1.msra.mxu1 %v193_v33  ;;  %411 = vmatpush1.msra.mxu0 %v364_v11  ;;  %v359_v16 = vld [vmem:[#allocation8 + $0xc8] sm:$0xff]  ;;  %v358_v17 = vld [vmem:[#allocation8 + $0xc0] sm:$0xff]  ;;  %v357_v18 = vld [vmem:[#allocation8 + $0xb8] sm:$0xff] }
  0x4f   :  { %285 = vmatprep.subr.mxu1 %v192_v34  ;;  %412 = vmatprep.subr.mxu0 %v363_v12  ;;  %v356_v19 = vld [vmem:[#allocation8 + $0xb0] sm:$0xff]  ;;  %v355_v20 = vld [vmem:[#allocation8 + $0xa8] sm:$0xff]  ;;  %v354_v21 = vld [vmem:[#allocation8 + $0xa0] sm:$0xff] }
  0x50   :  { %286 = vmatpush1.msra.mxu1 %v191_v35  ;;  %413 = vmatpush1.msra.mxu0 %v362_v13  ;;  %v353_v22 = vld [vmem:[#allocation8 + $0x98] sm:$0xff]  ;;  %v352_v23 = vld [vmem:[#allocation8 + $0x90] sm:$0xff]  ;;  %v351_v24 = vld [vmem:[#allocation8 + $0x88] sm:$0xff] }
  0x51   :  { %287 = vmatprep.subr.mxu1 %v190_v36  ;;  %414 = vmatprep.subr.mxu0 %v361_v14  ;;  %v350_v25 = vld [vmem:[#allocation8 + $0x80] sm:$0xff]  ;;  %v349_v26 = vld [vmem:[#allocation8 + $0x78] sm:$0xff]  ;;  %v348_v27 = vld [vmem:[#allocation8 + $0x70] sm:$0xff] }
  0x52   :  { %288 = vmatpush1.msra.mxu1 %v189_v37  ;;  %415 = vmatpush1.msra.mxu0 %v360_v15  ;;  %v347_v28 = vld [vmem:[#allocation8 + $0x68] sm:$0xff]  ;;  %v346_v29 = vld [vmem:[#allocation8 + $0x60] sm:$0xff]  ;;  %v345_v30 = vld [vmem:[#allocation8 + $0x58] sm:$0xff] }
  0x53   :  { %289 = vmatprep.subr.mxu1 %v188_v38  ;;  %416 = vmatprep.subr.mxu0 %v359_v16  ;;  %v344_v31 = vld [vmem:[#allocation8 + $0x50] sm:$0xff]  ;;  %v343_v32 = vld [vmem:[#allocation8 + $0x48] sm:$0xff]  ;;  %v342_v33 = vld [vmem:[#allocation8 + $0x40] sm:$0xff] }
  0x54   :  { %290 = vmatpush1.msra.mxu1 %v187_v39  ;;  %417 = vmatpush1.msra.mxu0 %v358_v17  ;;  %v341_v34 = vld [vmem:[#allocation8 + $0x38] sm:$0xff]  ;;  %v340_v35 = vld [vmem:[#allocation8 + $0x30] sm:$0xff]  ;;  %v339_v36 = vld [vmem:[#allocation8 + $0x28] sm:$0xff] }
  0x55   :  { %291 = vmatprep.subr.mxu1 %v186_v40  ;;  %418 = vmatprep.subr.mxu0 %v357_v18  ;;  %v338_v37 = vld [vmem:[#allocation8 + $0x20] sm:$0xff]  ;;  %v337_v38 = vld [vmem:[#allocation8 + $0x18] sm:$0xff]  ;;  %v336_v39 = vld [vmem:[#allocation8 + $0x10] sm:$0xff] }
  0x56   :  { %292 = vmatpush1.msra.mxu1 %v185_v41  ;;  %419 = vmatpush1.msra.mxu0 %v356_v19  ;;  %v335_v40 = vld [vmem:[#allocation8 + $0x8] sm:$0xff]  ;;  %v334_v41 = vld [vmem:[#allocation8] sm:$0xff]  ;;  %v373_v15 = vld [vmem:[#allocation8 + $0x138] sm:$0xff] }
  0x57   :  { %293 = vmatprep.subr.mxu1 %v248_v42  ;;  %420 = vmatprep.subr.mxu0 %v355_v20  ;;  %v397_v42 = vld [vmem:[#allocation8 + $0x1f8] sm:$0xff]  ;;  %v372_v16 = vld [vmem:[#allocation8 + $0x130] sm:$0xff]  ;;  %v371_v17 = vld [vmem:[#allocation8 + $0x128] sm:$0xff] }
  0x58   :  { %294 = vmatpush2.msra.mxu1 %v247_v43  ;;  %421 = vmatpush1.msra.mxu0 %v354_v21  ;;  %v396_v43 = vld [vmem:[#allocation8 + $0x1f0] sm:$0xff]  ;;  %v370_v18 = vld [vmem:[#allocation8 + $0x120] sm:$0xff]  ;;  %v369_v19 = vld [vmem:[#allocation8 + $0x118] sm:$0xff] }
  0x59   :  { %295 = vmatprep.subr.mxu1 %v246_v44  ;;  %422 = vmatprep.subr.mxu0 %v353_v22  ;;  %v395_v44 = vld [vmem:[#allocation8 + $0x1e8] sm:$0xff]  ;;  %v368_v20 = vld [vmem:[#allocation8 + $0x110] sm:$0xff]  ;;  %v366_v22 = vld [vmem:[#allocation8 + $0x100] sm:$0xff] }
  0x5a   :  { %296 = vmatpush2.msra.mxu1 %v245_v45  ;;  %423 = vmatpush1.msra.mxu0 %v352_v23  ;;  %v394_v45 = vld [vmem:[#allocation8 + $0x1e0] sm:$0xff]  ;;  %v367_v21 = vld [vmem:[#allocation8 + $0x108] sm:$0xff]  ;;  %v249_v23 = vld [vmem:[%s706_s4] sm:$0x3]  ;;  %s628_s4 = smov [#allocation10]  }
  0x5b   :  { %297 = vmatprep.subr.mxu1 %v244_v46  ;;  %424 = vmatprep.subr.mxu0 %v351_v24  ;;  %v393_v46 = vld [vmem:[#allocation8 + $0x1d8] sm:$0xff]  ;;  %s491_s24 = sshll.u32 %s628_s4, 4  ;;  %s492_s24 = int_to_ptr.vmem [resolvable:$true] %s491_s24 }
  0x5c   :  { %298 = vmatpush2.msra.mxu1 %v243_v47  ;;  %425 = vmatpush1.msra.mxu0 %v350_v25  ;;  %v392_v47 = vld [vmem:[#allocation8 + $0x1d0] sm:$0xff]  ;;  %s593_s25 = scalar_lea.vmem %s492_s24, 256  ;;  %p598_p7 = scmp.lt.s32.totalorder %s492_s24, %s492_s24 }
  0x5d   :  { %299 = vmatprep.subr.mxu1 %v242_v48  ;;  %426 = vmatprep.subr.mxu0 %v349_v26  ;;  %v391_v48 = vld [vmem:[#allocation8 + $0x1c8] sm:$0xff]  ;;  %p594_p6 = scmp.ne.s32.totalorder %s492_s24, %s593_s25  ;;  %p599_p8 = scmp.lt.s32.totalorder %s593_s25, %s593_s25 }
  0x5e   :  { %300 = vmatpush2.msra.mxu1 %v241_v49  ;;  %427 = vmatpush1.msra.mxu0 %v348_v27  ;;  %v390_v49 = vld [vmem:[#allocation8 + $0x1c0] sm:$0xff] }
  0x5f   :  { %301 = vmatprep.subr.mxu1 %v240_v50  ;;  %428 = vmatprep.subr.mxu0 %v347_v28  ;;  %v389_v50 = vld [vmem:[#allocation8 + $0x1b8] sm:$0xff]  ;;  %p600_p9 = por %p599_p8, %p598_p7 }
  0x60   :  { %302 = vmatpush2.msra.mxu1 %v239_v51  ;;  %429 = vmatpush1.msra.mxu0 %v346_v29  ;;  %v388_v51 = vld [vmem:[#allocation8 + $0x1b0] sm:$0xff] }
  0x61   :  { %303 = vmatprep.subr.mxu1 %v238_v52  ;;  %430 = vmatprep.subr.mxu0 %v345_v30  ;;  %v387_v52 = vld [vmem:[#allocation8 + $0x1a8] sm:$0xff]  ;;  %p601_p10 = pnand %p600_p9, %p594_p6 }
  0x62   :  { %304 = vmatpush2.msra.mxu1 %v237_v53  ;;  %431 = vmatpush1.msra.mxu0 %v344_v31  ;;  %v386_v53 = vld [vmem:[#allocation8 + $0x1a0] sm:$0xff] }
  0x63   :  { %305 = vmatprep.subr.mxu1 %v236_v54  ;;  %432 = vmatprep.subr.mxu0 %v343_v32  ;;  %v385_v54 = vld [vmem:[#allocation8 + $0x198] sm:$0xff] }
  0x64   :  { %306 = vmatpush2.msra.mxu1 %v235_v55  ;;  %433 = vmatpush1.msra.mxu0 %v342_v33  ;;  %v384_v55 = vld [vmem:[#allocation8 + $0x190] sm:$0xff]  ;;  %v398_v32 = vld [vmem:[%s708_s6] sm:$0x3] }
  0x65   :  { %307 = vmatprep.subr.mxu1 %v234_v56  ;;  %434 = vmatprep.subr.mxu0 %v341_v34  ;;  %v383_v56 = vld [vmem:[#allocation8 + $0x188] sm:$0xff] }
  0x66   :  { %308 = vmatpush2.msra.mxu1 %v233_v57  ;;  %435 = vmatpush1.msra.mxu0 %v340_v35  ;;  %v382_v57 = vld [vmem:[#allocation8 + $0x180] sm:$0xff] }
  0x67   :  { %309 = vmatprep.subr.mxu1 %v232_v58  ;;  %436 = vmatprep.subr.mxu0 %v339_v36  ;;  %v381_v58 = vld [vmem:[#allocation8 + $0x178] sm:$0xff] }
  0x68   :  { %310 = vmatpush2.msra.mxu1 %v231_v59  ;;  %437 = vmatpush1.msra.mxu0 %v338_v37  ;;  %v380_v59 = vld [vmem:[#allocation8 + $0x170] sm:$0xff] }
  0x69   :  { %311 = vmatprep.subr.mxu1 %v230_v60  ;;  %438 = vmatprep.subr.mxu0 %v337_v38  ;;  %v379_v60 = vld [vmem:[#allocation8 + $0x168] sm:$0xff] }
  0x6a   :  { %312 = vmatpush2.msra.mxu1 %v229_v61  ;;  %439 = vmatpush1.msra.mxu0 %v336_v39  ;;  %v378_v61 = vld [vmem:[#allocation8 + $0x160] sm:$0xff] }
  0x6b   :  { %313 = vmatprep.subr.mxu1 %v228_v62  ;;  %440 = vmatprep.subr.mxu0 %v335_v40  ;;  %v377_v62 = vld [vmem:[#allocation8 + $0x158] sm:$0xff] }
  0x6c   :  { %314 = vmatpush2.msra.mxu1 %v227_v63  ;;  %441 = vmatpush1.msra.mxu0 %v334_v41  ;;  %v376_v63 = vld [vmem:[#allocation8 + $0x150] sm:$0xff] }
  0x6d   :  { %315 = vmatprep.subr.mxu1 %v226_v0  ;;  %442 = vmatprep.subr.mxu0 %v397_v42  ;;  %v375_v0 = vld [vmem:[#allocation8 + $0x148] sm:$0xff] }
  0x6e   :  { %316 = vmatpush2.msra.mxu1 %v225_v1  ;;  %443 = vmatpush2.msra.mxu0 %v396_v43  ;;  %v374_v1 = vld [vmem:[#allocation8 + $0x140] sm:$0xff] }
  0x6f   :  { %317 = vmatprep.subr.mxu1 %v224_v2  ;;  %444 = vmatprep.subr.mxu0 %v395_v44  ;;  %v91_v2 = vlaneseq }
  0x70   :  { %318 = vmatpush2.msra.mxu1 %v223_v3  ;;  %445 = vmatpush2.msra.mxu0 %v394_v45 }
  0x71   :  { %319 = vmatprep.subr.mxu1 %v222_v4  ;;  %446 = vmatprep.subr.mxu0 %v393_v46  ;;  %v92_v3 = vshrl.u32 %v91_v2, 7 }
  0x72   :  { %320 = vmatpush2.msra.mxu1 %v221_v5  ;;  %447 = vmatpush2.msra.mxu0 %v392_v47  ;;  %v89_v5 = vld [vmem:[%s704_s2] sm:$0x3] }
  0x73   :  { %321 = vmatprep.subr.mxu1 %v220_v6  ;;  %448 = vmatprep.subr.mxu0 %v391_v48  ;;  %v93_v4 = vsub.s32 0, %v92_v3  ;;  %v97_v6 = vsub.s32 1, %v92_v3 }
  0x74   :  { %322 = vmatpush2.msra.mxu1 %v219_v7  ;;  %449 = vmatpush2.msra.mxu0 %v390_v49 }
  0x75   :  { %323 = vmatprep.subr.mxu1 %v218_v8  ;;  %450 = vmatprep.subr.mxu0 %v389_v50  ;;  %v94_v7 = vrot.slane %v89_v5, %v93_v4  ;;  %v98_v8 = vrot.slane %v89_v5, %v97_v6  ;;  %v254_v24 = vrot.slane %v249_v23, %v93_v4 }
  0x76   :  { %324 = vmatpush2.msra.mxu1 %v217_v9  ;;  %451 = vmatpush2.msra.mxu0 %v388_v51  ;;  %v258_v25 = vrot.slane %v249_v23, %v97_v6  ;;  %v403_v33 = vrot.slane %v398_v32, %v93_v4  ;;  %v407_v34 = vrot.slane %v398_v32, %v97_v6 }
  0x77   :  { %452 = vmatprep.subr.mxu0 %v387_v52 }
  0x78   :  { %453 = vmatpush2.msra.mxu0 %v386_v53 }
  0x79   :  { %454 = vmatprep.subr.mxu0 %v385_v54 }
  0x7a   :  { %455 = vmatpush2.msra.mxu0 %v384_v55 }
  0x7b   :  { %456 = vmatprep.subr.mxu0 %v383_v56 }
  0x7c   :  { %457 = vmatpush2.msra.mxu0 %v382_v57 }
  0x7d   :  { %458 = vmatprep.subr.mxu0 %v381_v58 }
  0x7e   :  { %459 = vmatpush2.msra.mxu0 %v380_v59 }
  0x7f   :  { %460 = vmatprep.subr.mxu0 %v379_v60 }
  0x80   :  { %461 = vmatpush2.msra.mxu0 %v378_v61 }
  0x81   :  { %462 = vmatprep.subr.mxu0 %v377_v62 }
  0x82   :  { %463 = vmatpush2.msra.mxu0 %v376_v63 }
  0x83   :  { %464 = vmatprep.subr.mxu0 %v375_v0 }
  0x84   :  { %465 = vmatpush2.msra.mxu0 %v374_v1 }
  0x85   :  { %466 = vmatprep.subr.mxu0 %v373_v15 }
  0x86   :  { %467 = vmatpush2.msra.mxu0 %v372_v16 }
  0x87   :  { %468 = vmatprep.subr.mxu0 %v371_v17 }
  0x88   :  { %469 = vmatpush2.msra.mxu0 %v370_v18 }
  0x89   :  { %470 = vmatprep.subr.mxu0 %v369_v19 }
  0x8a   :  { %471 = vmatpush2.msra.mxu0 %v368_v20 }
  0x8b   :  { %472 = vmatprep.subr.mxu0 %v367_v21 }
  0x8c   :  { %473 = vmatpush2.msra.mxu0 %v366_v22 }
  0xfc   :  { %v178_v9 = vpop.f32.mrf.mxu0 }
  0xfd   :  { %v179_v10 = vadd.f32 %v178_v9, %v94_v7 }
  0xfe   :  { %v180_v11 = vpop.f32.mrf.mxu0 }
  0xff   :  { %v181_v12 = vadd.f32 %v180_v11, %v98_v8  ;;  %v183_v14 = vmax.f32 %v179_v10, 0.0 }
 0x101   :  { %v184_v13 = vmax.f32 %v181_v12, 0.0 }
 0x103   :  { %325 = vmatprep.mubr.f32.mxu1 %v184_v13 }
 0x104   :  { %326 = vmatmul.mubr.f32.vlgmr.msra.gmra.mxu1 %v183_v14 }
 0x1c4   :  { %v327_v26 = vpop.f32.mrf.mxu1 }
 0x1c5   :  { %v328_v27 = vadd.f32 %v327_v26, %v254_v24 }
 0x1c6   :  { %v329_v28 = vpop.f32.mrf.mxu1 }
 0x1c7   :  { %v330_v29 = vadd.f32 %v329_v28, %v258_v25  ;;  %v332_v31 = vmax.f32 %v328_v27, 0.0 }
 0x1c9   :  { %v333_v30 = vmax.f32 %v330_v29, 0.0 }
 0x1cb   :  { %474 = vmatprep.mubr.f32.mxu0 %v333_v30 }
 0x1cc   :  { %475 = vmatmul.mubr.f32.vlgmr.msra.gmra.mxu0 %v332_v31 }
 0x28c   :  { %v476_v35 = vpop.f32.mrf.mxu0 }
 0x28d   :  { %v477_v36 = vadd.f32 %v476_v35, %v403_v33 }
 0x28e   :  { %v478_v37 = vpop.f32.mrf.mxu0 }
 0x28f   :  { %v481_v38 = vmax.f32 %v477_v36, 0.0  ;;  %v479_v39 = vadd.f32 %v478_v37, %v407_v34 }
 0x291   :  { %483 = vst [vmem:[#allocation10] sm:$0xff] %v481_v38  ;;  %v482_v40 = vmax.f32 %v479_v39, 0.0 }
 0x293   :  { %484 = vst [vmem:[#allocation10 + $0x8] sm:$0xff] %v482_v40 }
 0x294   :  { %604 = shalt.err (!%p601_p10)
}
 0x295   :  { %494 = dma.vmem_to_hbm [thread:$0]  %s492_s24, 256, %s709_s7, [#allocation4]  }
 0x296   :  { %619 = dma.done.wait [#allocation4], 256  }
 0x297   :  { %620 = vsyncadd [#allocation4], 4294967040 }
 0x298   :  { %498 = vsyncpa [#allocation3], 1 }
 0x299   :  { %499 = vsyncpa [#allocation6], 1 }
 0x29a   :  { %500 = vsyncpa [#allocation9], 1 }
 0x29b   :  { %501 = vsyncpa [#allocation4], 1 }

</bundles_post_ra>
